<compile_context>
chip_gen: v7x
topology: tpu7x:2x2x1
jax: 0.10.0
libtpu: 0.0.40
codegen_flags: <defaults>
</compile_context>

<pallas_src>
import jax
import jax.numpy as jnp
import numpy as np
from jax.experimental import pallas as pl
from jax.experimental.pallas import tpu as pltpu

_LANE = 128
_TARGET_BLOCK_BYTES = 2 << 20     # ~2 MiB per (bs, tf) block (dtype-aware below)
_MIN_PALLAS_BYTES = 1 << 20       # below this total X size, plain JAX wins
_MAX_MATMUL_BS = 2048             # above this, bs^2*F FLOPs stop being "free"
_MIN_GRID = 2                     # v7x: expose >= 2 shards for its 2 TensorCores
_VMEM_LIMIT = 32 * 1024 * 1024    # <= scoped default on v6e/v7x, < physical on v5e


def _cdiv(a, b):
    return -(-a // b)


# ----------------------------------------------------------------------------
# Kernel: one grid step = one feature tile of the flattened X, all batch rows.
# ----------------------------------------------------------------------------
def _mix_matmul_kernel(m_ref, x_ref, o_ref):
    """out_tile = M @ x_tile  on the MXU.

    m_ref : (bs, bs) f32 mix matrix (same block every step -> stays resident)
    x_ref : (bs, tf) feature tile of X flattened to (bs, F)
    o_ref : (bs, tf) output tile
    """
    m = m_ref[...]
    x = x_ref[...].astype(jnp.float32)          # no-op for f32, widen for bf16
    o_ref[...] = jnp.dot(m, x, preferred_element_type=jnp.float32).astype(o_ref.dtype)


def _feature_tile(bs, F, itemsize):
    """Pick a lane-aligned feature tile tf (bytes-budgeted, >=2 grid steps)."""
    if F < _LANE:
        # Tiny feature count: single full-extent block (usually fallback path).
        return F, 1
    f_lanes = _cdiv(F, _LANE) * _LANE
    max_tf = max(_LANE, (_TARGET_BLOCK_BYTES // (bs * itemsize)) // _LANE * _LANE)
    tf = min(max_tf, f_lanes)
    # v7x has 2 TensorCores per chip: keep >= _MIN_GRID parallel shards if we can.
    while tf > _LANE and _cdiv(F, tf) < _MIN_GRID:
        tf = max(_LANE, ((tf // 2) // _LANE) * _LANE)
    return tf, _cdiv(F, tf)


def _build_mix_matrix(perm, coeffs):
    """M[i, i] += c_i ; M[i, perm[i]] += 1 - c_i   (handles perm[i] == i)."""
    bs = coeffs.shape[0]
    rows = jnp.arange(bs)
    c = coeffs.astype(jnp.float32)
    m = jnp.zeros((bs, bs), jnp.float32)
    m = m.at[rows, rows].add(c)
    m = m.at[rows, perm].add(1.0 - c)
    return m


def _mixup_rows_pallas(x2d, mix_mat):
    """out = mix_mat @ x2d, tiled along the feature axis (no pad / no slice)."""
    bs, F = x2d.shape
    tf, n_tiles = _feature_tile(bs, F, x2d.dtype.itemsize)

    return pl.pallas_call(
        _mix_matmul_kernel,
        grid=(n_tiles,),
        in_specs=[
            pl.BlockSpec((bs, bs), lambda j: (0, 0)),   # tiny mix matrix, resident
            pl.BlockSpec((bs, tf), lambda j: (0, j)),   # X feature tile
        ],
        out_specs=pl.BlockSpec((bs, tf), lambda j: (0, j)),
        out_shape=jax.ShapeDtypeStruct((bs, F), x2d.dtype),
        compiler_params=pltpu.CompilerParams(
            dimension_semantics=("parallel",),
            vmem_limit_bytes=_VMEM_LIMIT,
        ),
    )(mix_mat, x2d)


# ----------------------------------------------------------------------------
# Wrappers
# ----------------------------------------------------------------------------
def mixup_pallas(X, Y, weight, perm, coeffs, force_pallas=None):
    """Apply mixup with a precomputed permutation and Beta coefficients."""
    bs = X.shape[0]
    x2d = X.reshape(bs, -1)                      # zero-copy for default layouts

    use_pallas = force_pallas
    if use_pallas is None:
        big_enough = X.size * X.dtype.itemsize >= _MIN_PALLAS_BYTES
        use_pallas = big_enough and bs <= _MAX_MATMUL_BS

    if use_pallas:
        mix_mat = _build_mix_matrix(perm, coeffs)
        Xm = _mixup_rows_pallas(x2d, mix_mat).reshape(X.shape)
    else:
        # Tiny tensors (grid-step overhead dominates) or huge batches (matmul
        # FLOPs no longer free): fused plain-JAX gather + lerp.
        # TODO(synk): reinstate a gather-based Pallas kernel for bs > ~2k.
        c_x = coeffs.reshape((bs,) + (1,) * (X.ndim - 1)).astype(jnp.float32)
        Xm = (c_x * X + (1.0 - c_x) * X[perm]).astype(X.dtype)

    # Y / weight are tiny: plain JAX (keeping them in the kernel only added
    # per-step DMA + masked-store overhead).
    c_y = coeffs.reshape((bs,) + (1,) * (Y.ndim - 1)).astype(jnp.float32)
    Ym = (c_y * Y + (1.0 - c_y) * Y[perm]).astype(Y.dtype)
    c_w = coeffs.astype(jnp.float32)
    Wm = (c_w * weight + (1.0 - c_w) * weight[perm]).astype(weight.dtype)
    return Xm, Ym, Wm


def mixup(key, X, Y, weight=None, mix_beta=1.0):
    """Full Mixup.forward equivalent: sample perm + Beta coeffs, then mix."""
    bs = X.shape[0]
    kp, kc = jax.random.split(key)
    perm = jax.random.permutation(kp, bs)
    coeffs = jax.random.beta(kc, mix_beta, mix_beta, shape=(bs,), dtype=jnp.float32)
    Xm, Ym, Wm = mixup_pallas(
        X, Y,
        weight if weight is not None else jnp.ones((bs,), X.dtype),
        perm, coeffs)
    if weight is None:
        return Xm, Ym
    return Xm, Ym, Wm


def _reference(X, Y, W, perm, coeffs):
    c_x = coeffs.reshape((-1,) + (1,) * (X.ndim - 1))
    c_y = coeffs.reshape((-1,) + (1,) * (Y.ndim - 1))
    Xr = c_x * X + (1 - c_x) * X[perm]
    Yr = c_y * Y + (1 - c_y) * Y[perm]
    Wr = coeffs * W + (1 - coeffs) * W[perm]
    return Xr, Yr, Wr


# ----------------------------------------------------------------------------
# Self-test
# ----------------------------------------------------------------------------
if __name__ == "__main__":
    key = jax.random.PRNGKey(0)
    ks = jax.random.split(key, 10)

    # ---- Test A: rank-4 X, 128-aligned features, f32, forced Pallas path ----
    bs, C, H, Wd = 8, 4, 16, 16          # F = 1024
    T, K = 8, 6
    X = jax.random.normal(ks[0], (bs, C, H, Wd), dtype=jnp.float32)
    Y = jax.random.normal(ks[1], (bs, T, K), dtype=jnp.float32)
    W = jax.random.uniform(ks[2], (bs,), dtype=jnp.float32)
    perm = jax.random.permutation(ks[3], bs)
    coeffs = jax.random.beta(ks[4], 1.0, 1.0, shape=(bs,), dtype=jnp.float32)

    Xm, Ym, Wm = mixup_pallas(X, Y, W, perm, coeffs, force_pallas=True)
    jax.block_until_ready((Xm, Ym, Wm))
    Xr, Yr, Wr = _reference(X, Y, W, perm, coeffs)
    np.testing.assert_allclose(np.asarray(Xm), np.asarray(Xr), rtol=1e-5, atol=1e-5)
    np.testing.assert_allclose(np.asarray(Ym), np.asarray(Yr), rtol=1e-5, atol=1e-6)
    np.testing.assert_allclose(np.asarray(Wm), np.asarray(Wr), rtol=1e-5, atol=1e-6)

    # ---- Test B: rank-3 X, unaligned feature count (ragged final block) ----
    X3 = jax.random.normal(ks[5], (bs, 30, 10), dtype=jnp.float32)   # F = 300
    Xm3, Ym3, Wm3 = mixup_pallas(X3, Y, W, perm, coeffs, force_pallas=True)
    jax.block_until_ready(Xm3)
    Xr3, _, _ = _reference(X3, Y, W, perm, coeffs)
    np.testing.assert_allclose(np.asarray(Xm3), np.asarray(Xr3), rtol=1e-5, atol=1e-5)

    # ---- Test C: bf16 X through the Pallas path (f32 accumulation) ----
    Xb = X.astype(jnp.bfloat16)
    Xmb, _, _ = mixup_pallas(Xb, Y, W, perm, coeffs, force_pallas=True)
    jax.block_until_ready(Xmb)
    Xrb, _, _ = _reference(Xb.astype(jnp.float32), Y, W, perm, coeffs)
    np.testing.assert_allclose(np.asarray(Xmb, dtype=np.float32), np.asarray(Xrb),
                               rtol=3e-2, atol=3e-2)

    # ---- Test D: tiny input, auto small-tensor fallback (plain JAX path) ----
    bs_t = 4
    Xt = jax.random.normal(ks[6], (bs_t, 2, 4, 4), dtype=jnp.float32)
    Yt = jax.random.normal(ks[7], (bs_t, T, K), dtype=jnp.float32)
    Wt = jax.random.uniform(ks[8], (bs_t,), dtype=jnp.float32)
    perm_t = jax.random.permutation(ks[9], bs_t)
    coeffs_t = coeffs[:bs_t]
    Xmt, Ymt, Wmt = mixup_pallas(Xt, Yt, Wt, perm_t, coeffs_t)   # auto path
    jax.block_until_ready(Xmt)
    Xrt, Yrt, Wrt = _reference(Xt, Yt, Wt, perm_t, coeffs_t)
    np.testing.assert_allclose(np.asarray(Xmt), np.asarray(Xrt), rtol=1e-5, atol=1e-6)
    np.testing.assert_allclose(np.asarray(Ymt), np.asarray(Yrt), rtol=1e-5, atol=1e-6)
    np.testing.assert_allclose(np.asarray(Wmt), np.asarray(Wrt), rtol=1e-5, atol=1e-6)

    print("KERNEL_OK")
</pallas_src>

<mosaic_0001>
module attributes {stable_mosaic.version = 11 : i64} {
  func.func @_mix_matmul_kernel(%arg0: i32, %arg1: memref<8x8xf32, #tpu.memory_space<vmem>>, %arg2: memref<8x512xf32, #tpu.memory_space<vmem>>, %arg3: memref<8x512xf32, #tpu.memory_space<vmem>>) attributes {dimension_semantics = [#tpu.dimension_semantics<parallel>], iteration_bounds = array<i64: 2>, scalar_prefetch = 0 : i64, scratch_operands = 0 : i64, tpu.core_type = #tpu.core_type<tc>, window_params = [{pipeline_mode = #tpu.pipeline_mode<synchronous>, transform_indices = @transform_0, window_bounds = array<i64: 8, 8>}, {transform_indices = @transform_1, window_bounds = array<i64: 8, 512>}, {transform_indices = @transform_2, window_bounds = array<i64: 8, 512>}]} {
    %c0 = arith.constant 0 : index
    %c0_0 = arith.constant 0 : index
    %0 = vector.load %arg1[%c0, %c0_0] : memref<8x8xf32, #tpu.memory_space<vmem>>, vector<8x8xf32>
    %c0_1 = arith.constant 0 : index
    %c0_2 = arith.constant 0 : index
    %1 = vector.load %arg2[%c0_1, %c0_2] : memref<8x512xf32, #tpu.memory_space<vmem>>, vector<8x512xf32>
    %cst = arith.constant dense<0.000000e+00> : vector<8x512xf32>
    %2 = tpu.matmul %0, %1, %cst {dimension_numbers = #tpu.dot_dimension_numbers<[1], [0], [0], [1], [0, 0, 1, 1], [], []>} : vector<8x8xf32>, vector<8x512xf32>, vector<8x512xf32> -> vector<8x512xf32>
    %c0_3 = arith.constant 0 : index
    %c0_4 = arith.constant 0 : index
    %3 = vector.load %arg3[%c0_3, %c0_4] : memref<8x512xf32, #tpu.memory_space<vmem>>, vector<8x512xf32>
    tpu.vector_store %arg3[%c0_3, %c0_4], %2 {strides = array<i32>} : memref<8x512xf32, #tpu.memory_space<vmem>>, vector<8x512xf32>,
    return
  }
  func.func @transform_0(%arg0: i32) -> (i32, i32) {
    %c0_i32 = arith.constant 0 : i32
    %c0_i32_0 = arith.constant 0 : i32
    %c0_i32_1 = arith.constant 0 : i32
    return %c0_i32, %c0_i32_0 : i32, i32
  }
  func.func @transform_1(%arg0: i32) -> (i32, i32) {
    %c0_i32 = arith.constant 0 : i32
    %c0_i32_0 = arith.constant 0 : i32
    return %c0_i32, %arg0 : i32, i32
  }
  func.func @transform_2(%arg0: i32) -> (i32, i32) {
    %c0_i32 = arith.constant 0 : i32
    %c0_i32_0 = arith.constant 0 : i32
    return %c0_i32, %arg0 : i32, i32
  }
}

</mosaic_0001>

<bundles_post_ra>
// kernel: tpu_custom_call.1
= control target key start
LH: loop header
LB: loop body
LE: loop exit
PB: predicated region body
PF: predicated region fallthrough
CT: control target
= control target key end

     0   :  { %7 = vsyncpa [#allocation3], 0  ;;  %s855_s0 = inlined_call_operand.hbm [shape: f32[8,8], index: 0, kind: input, shape index: {}]   ;;  %s856_s1 = inlined_call_operand.hbm [shape: f32[8,1024], index: 1, kind: input, shape index: {}]   ;;  %s857_s2 = inlined_call_operand.hbm [shape: f32[8,1024], index: 2, kind: output, shape index: {}]  }
   0x1   :  { %8 = vsyncpa [#allocation6], 0 }
   0x2   :  { %10 = vsyncpa [#allocation6 + $0x1], 0 }
   0x3   :  { %11 = vsyncpa [#allocation4], 0 }
   0x4   :  { %13 = vsyncpa [#allocation4 + $0x1], 0  ;;  %s654_s9 = smov 0   ;;  %s656_s10 = smov 0  }
   0x5   :  { %s658_s11 = smov 0   ;;  %s660_s12 = smov 0  }
   0x6 LB: > { %s675_s13 = sadd.s32 4294967295, %s633_s12   ;;  %s427_s14 = sadd.s32 4294967294, %s633_s12   ;;  %s633_s12 = sphi %s660_s12, %s881_s12   ;;  %s629_s11 = sphi %s658_s11, %s880_s11   ;;  %s625_s10 = sphi %s656_s10, %s879_s10   ;;  %s621_s9 = sphi %s654_s9, %s878_s9  }
   0x7   : > { %p60_p0 = scmp.ne.s32.totalorder %s625_s10, %s621_s9  ;;  %p858_p1 = scmp.eq.s32.totalorder %s675_s13, 0 }
   0x8   : > { %p90_p3 = scmp.eq.s32.totalorder %s427_s14, 1  ;;  %p428_p5 = scmp.ge.s32.totalorder %s633_s12, 1 }
   0x9   : > { %p684_p4 = por %p858_p1, %p60_p0  ;;  %p97_p7 = scmp.lt.s32.totalorder %s633_s12, 3 }
   0xa   : > { %p689_p6 = por %p90_p3, %p60_p0  ;;  %s635_s18 = smov [#allocation2]  }
   0xb   : > { %s861_s15 = scalar_select %p684_p4, 1, 0 }
   0xc   : > { %s862_s16 = scalar_select %p689_p6, 1, 0 }
   0xd   : > { %p694_p8 = pnand %p428_p5, %p97_p7  ;;  %s110_s19 = sshll.u32 %s635_s18, 4  ;;  %s111_s19 = int_to_ptr.vmem [resolvable:$true] %s110_s19 }
   0xe   : > { %s702_s20 = sadd.s32 1, %s633_s12   ;;  %s47_s24 = sadd.s32 1, %s629_s11 }
   0xf   : > { %s863_s17 = scalar_select %p694_p8, 1, 0 }
  0x10   : > { %p455_p10 = pneg %p694_p8  ;;  %s44_s22 = ssub.s32 %s633_s12, %s702_s20 }
  0x11   : > { %p712_p12 = scmp.eq.s32.totalorder %s44_s22, 0  ;;  %s505_s27 = scalar_lea.hbm %s855_s0, 128 }
  0x12   : > { %p706_p11 = pnand %p455_p10, %p858_p1  ;;  %p506_p0 = scmp.ne.s32.totalorder %s855_s0, %s505_s27 }
  0x13   : > { %s865_s23 = scalar_select %p712_p12, 1, 0 }
  0x14   : > { %p507_p3 = pneg %p706_p11  ;;  %p512_p10 = scmp.lt.u32.totalorder %s505_s27, %s855_s0 }
  0x16   : > { %p508_p5 = pnand %p507_p3, %p506_p0 }
  0x18   : > { %p509_p7 = pneg %p508_p5 }
  0x1a   : > { %p514_p9 = pnand %p512_p10, %p509_p7 }
  0x1c   : > { %517 = shalt.err (!%p514_p9)
}
  0x1d   : > { %s518_s4 = scalar_lea.vmem %s111_s19, 128  ;;  %p526_p6 = scmp.lt.s32.totalorder %s111_s19, %s111_s19 }
  0x1e   : > { %p519_p1 = scmp.ne.s32.totalorder %s111_s19, %s518_s4  ;;  %p527_p4 = scmp.lt.s32.totalorder %s518_s4, %s518_s4 }
  0x20   : > { %p521_p2 = pnand %p519_p1, %p507_p3  ;;  %p528_p8 = por %p527_p4, %p526_p6 }
  0x22   : > { %p522_p13 = pneg %p521_p2 }
  0x24   : > { %p529_p12 = pnand %p528_p8, %p522_p13 }
  0x26   : > { %532 = shalt.err (!%p529_p12)
}
  0x27   : > { %458 = dma.hbm_to_vmem [thread:$0]  (!%p706_p11), %s855_s0, 128, %s111_s19, [#allocation3]  }
  0x28   : > { %p866_p1 = scmp.ne.s32.totalorder %s865_s23, 0  ;;  %p55_p2 = scmp.eq.s32.totalorder %s633_s12, 0 }
  0x29   : > { %p867_p4 = scmp.ne.s32.totalorder %s629_s11, %s625_s10  ;;  %p868_p6 = scmp.eq.s32.totalorder %s675_s13, 1 }
  0x2a   : > { %s738_s7 = scalar_select %p866_p1, %s629_s11, %s47_s24  }
  0x2b   : > { %p746_p8 = por %p868_p6, %p867_p4  ;;  %p468_p9 = scmp.lt.s32.totalorder %s633_s12, 2 }
  0x2c   : > { %s121_s14 = sand.u32 1, %s629_s11   ;;  %p870_p12 = pmov %p867_p4 }
  0x2d   : > { %s431_s18 = sshll.u32 %s121_s14, 5  ;;  %s445_s21 = sshll.u32 %s633_s12, 9 }
  0x2e   : > { %p56_p13 = por %p55_p2, %p870_p12  ;;  %s759_s19 = scalar_lea.hbm %s856_s1, %s445_s21 }
  0x2f   : > { %s125_s23 = scalar_lea.vmem [#allocation5], %s431_s18  ;;  %s122_s27 = scalar_lea.sflag [#allocation6], %s121_s14 }
  0x30   : > { %s133_s24 = sshll.u32 %s125_s23, 4  ;;  %p761_p11 = pnand %p468_p9, %p56_p13  ;;  %s765_s24 = int_to_ptr.vmem [resolvable:$true] %s133_s24 }
  0x31   : > { %s533_s28 = scalar_lea.hbm %s759_s19, 512  ;;  %s538_s3 = scalar_lea.hbm %s856_s1, 1024 }
  0x32   : > { %p534_p0 = scmp.ne.s32.totalorder %s759_s19, %s533_s28  ;;  %p535_p3 = pneg %p761_p11 }
  0x33   : > { %p539_p10 = scmp.lt.u32.totalorder %s759_s19, %s856_s1  ;;  %p540_p1 = scmp.lt.u32.totalorder %s538_s3, %s533_s28 }
  0x34   : > { %p536_p5 = pnand %p535_p3, %p534_p0  ;;  %p542_p4 = scmp.lt.u32.totalorder %s533_s28, %s759_s19 }
  0x35   : > { %p541_p2 = por %p540_p1, %p539_p10 }
  0x36   : > { %p537_p7 = pneg %p536_p5 }
  0x37   : > { %p543_p6 = por %p542_p4, %p541_p2 }
  0x39   : > { %p544_p9 = pnand %p543_p6, %p537_p7 }
  0x3b   : > { %547 = shalt.err (!%p544_p9)
}
  0x3c   : > { %s548_s6 = scalar_lea.vmem %s765_s24, 512  ;;  %s636_s14 = smov [#allocation5]  }
  0x3d   : > { %p549_p12 = scmp.ne.s32.totalorder %s765_s24, %s548_s6  ;;  %s553_s18 = sshll.u32 %s636_s14, 4  ;;  %s554_s18 = int_to_ptr.vmem [resolvable:$false] %s553_s18 }
  0x3e   : > { %s555_s21 = scalar_lea.vmem %s554_s18, 1024  ;;  %p556_p5 = scmp.lt.s32.totalorder %s765_s24, %s554_s18 }
  0x3f   : > { %p551_p13 = pnand %p549_p12, %p535_p3  ;;  %p557_p10 = scmp.lt.s32.totalorder %s555_s21, %s548_s6 }
  0x41   : > { %p552_p0 = pneg %p551_p13  ;;  %p558_p1 = por %p557_p10, %p556_p5 }
  0x43   : > { %p559_p2 = pnand %p558_p1, %p552_p0 }
  0x45   : > { %562 = shalt.err (!%p559_p2)
}
  0x46   : > { %462 = dma.hbm_to_vmem [thread:$0]  (!%p761_p11), %s759_s19, 512, %s765_s24, %s122_s27  }
  0x47   : > { %p872_p7 = scmp.ne.s32.totalorder %s863_s17, 0 }
  0x48   : > { %p873_p3 = scmp.eq.s32.totalorder (!%p872_p7), %s675_s13, 0 }
  0x49   : > { %142 = sbr.rel (%p872_p7) target bundleno = 316 (0x13c), region = 28 }
  0x50   : > { %608 = dma.done.wait (%p873_p3), [#allocation3], 128   ;;  %p874_p4 = pmov %p873_p3 }
  0x51   : > { %s799_s22 = sand.u32 1, %s625_s10   ;;  %p875_p6 = scmp.ne.s32.totalorder %s861_s15, 0 }
  0x52   : > { %610 = vsyncadd (%p874_p4), [#allocation3], 4294967168  ;;  %s436_s25 = sshll.u32 %s799_s22, 5  ;;  %s149_s23 = scalar_lea.sflag [#allocation6], %s799_s22 }
  0x53   : > { %s152_s26 = scalar_lea.vmem [#allocation5], %s436_s25 }
  0x54   : > { %612 = dma.done.wait (%p875_p6), %s149_s23, 512  }
  0x55   : > { %614 = vsyncadd (%p875_p6), %s149_s23, 4294966784  ;;  %v637_v0 = vmov 0.0   ;;  %v177_v1 = vld [vmem:[%s152_s26 + $0x8] sm:$0xff]  ;;  %v179_v2 = vld [vmem:[%s152_s26 + $0x18] sm:$0xff]  ;;  %vm180_vm0 = vcmask 64512   ;;  %s172_s17 = scalar_lea.vmem [#allocation7], %s436_s25 }
  0x56   : > { %248 = vmatprep.mubr.f32.mxu0 %v637_v0  ;;  %319 = vmatprep.mubr.f32.mxu1 %v637_v0  ;;  %v176_v3 = vld [vmem:[%s152_s26] sm:$0xff]  ;;  %v178_v4 = vld [vmem:[%s152_s26 + $0x10] sm:$0xff]  ;;  %v175_v5 = vld [vmem:[#allocation2] sm:$0xff]  ;;  %s345_s15 = sshll.u32 %s172_s17, 4  ;;  %s446_s19 = sshll.u32 %s675_s13, 9  ;;  %s808_s15 = int_to_ptr.vmem [resolvable:$true] %s345_s15 }
  0x57   : > { %184 = vmatprep.subr.mxu0 %v177_v1  ;;  %255 = vmatprep.subr.mxu1 %v179_v2  ;;  %s813_s28 = scalar_lea.hbm %s857_s2, %s446_s19  ;;  %s331_s29 = scalar_lea.sflag [#allocation4], %s799_s22 }
  0x58   : > { %185 = vmatpush1.msra.mxu0 %v176_v3  ;;  %256 = vmatpush1.msra.mxu1 %v178_v4  ;;  %s563_s13 = scalar_lea.vmem %s808_s15, 512  ;;  %s638_s30 = smov [#allocation7]  }
  0x59   : > { %438 = vmatmul.mubr.msk.f32.vlgmr.msra.gmra.mrb[0].mxu0 %vm180_vm0, %v175_v5  ;;  %439 = vmatmul.mubr.msk.f32.vlgmr.msra.gmra.mrb[0].mxu1 %vm180_vm0, %v175_v5  ;;  %p564_p11 = scmp.ne.s32.totalorder %s808_s15, %s563_s13  ;;  %s567_s3 = sshll.u32 %s638_s30, 4  ;;  %s568_s3 = int_to_ptr.vmem [resolvable:$false] %s567_s3 }
  0x5a   : > { %s569_s4 = scalar_lea.vmem %s568_s3, 1024  ;;  %p570_p13 = scmp.lt.s32.totalorder %s808_s15, %s568_s3 }
  0x5b   : > { %p565_p9 = pnand %p564_p11, %p746_p8  ;;  %p571_p0 = scmp.lt.s32.totalorder %s569_s4, %s563_s13 }
  0x5d   : > { %p566_p12 = pneg %p565_p9  ;;  %p572_p5 = por %p571_p0, %p570_p13 }
  0x5f   : > { %p573_p10 = pnand %p572_p5, %p566_p12 }
 0x12c   : > { %v250_v6 = vpop.f32.mrb[0].mxu0  ;;  %v321_v7 = vpop.f32.mrb[0].mxu1 }
 0x12d   : > { %326 = vst [vmem:[%s172_s17] sm:$0xff] %v250_v6  ;;  %328 = vst [vmem:[%s172_s17 + $0x10] sm:$0xff] %v321_v7  ;;  %v252_v8 = vpop.f32.mrb[1].mxu0  ;;  %v323_v9 = vpop.f32.mrb[1].mxu1 }
 0x12e   : > { %327 = vst [vmem:[%s172_s17 + $0x8] sm:$0xff] %v252_v8  ;;  %329 = vst [vmem:[%s172_s17 + $0x18] sm:$0xff] %v323_v9 }
 0x12f   : > { %576 = shalt.err (!%p573_p10)
}
 0x130   : > { %s577_s5 = scalar_lea.hbm %s813_s28, 512  ;;  %s581_s18 = scalar_lea.hbm %s857_s2, 1024 }
 0x131   : > { %p578_p1 = scmp.ne.s32.totalorder %s813_s28, %s577_s5  ;;  %p582_p3 = scmp.lt.u32.totalorder %s813_s28, %s857_s2 }
 0x132   : > { %p583_p4 = scmp.lt.u32.totalorder %s581_s18, %s577_s5  ;;  %p585_p11 = scmp.lt.u32.totalorder %s577_s5, %s813_s28 }
 0x133   : > { %p579_p2 = pnand %p578_p1, %p746_p8 }
 0x134   : > { %p584_p6 = por %p583_p4, %p582_p3 }
 0x135   : > { %p580_p7 = pneg %p579_p2 }
 0x136   : > { %p586_p9 = por %p585_p11, %p584_p6 }
 0x138   : > { %p587_p12 = pnand %p586_p9, %p580_p7 }
 0x13a   : > { %590 = shalt.err (!%p587_p12)
}
 0x13b   : > { %453 = dma.vmem_to_hbm [thread:$0]  (%p746_p8), %s808_s15, 512, %s813_s28, %s331_s29  }
 0x13c PF: > { %s357_s25 = sand.u32 1, %s621_s9   ;;  %p876_p13 = scmp.ne.s32.totalorder %s862_s16, 0 }
 0x13d   : > { %p877_p0 = scmp.ge.s32.totalorder %s633_s12, 2  ;;  %s358_s23 = scalar_lea.sflag [#allocation4], %s357_s25 }
 0x13f   : > { %p464_p5 = pnand %p877_p0, %p876_p13 }
 0x141   : > { %616 = dma.done.wait (!%p464_p5), %s358_s23, 512  }
 0x142   : > { %618 = vsyncadd (!%p464_p5), %s358_s23, 4294966784  ;;  %p16_p10 = scmp.ge.s32.totalorder %s702_s20, 4   ;;  %s878_s9 = smov %s625_s10 }
 0x143   : > { %s879_s10 = smov %s629_s11  ;;  %s880_s11 = smov %s738_s7 }
 0x144   : > { %s881_s12 = smov %s702_s20  ;;  %18 = sbr.rel (!%p16_p10) target bundleno = 6 (0x6), region = 78 }
 0x14b   :  { %363 = vsyncpa [#allocation3], 1 }
 0x14c   :  { %365 = vsyncpa [#allocation3 + $0x1], 1 }
 0x14d   :  { %366 = vsyncpa [#allocation6], 1 }
 0x14e   :  { %368 = vsyncpa [#allocation6 + $0x1], 1 }
 0x14f   :  { %369 = vsyncpa [#allocation4], 1 }
 0x150   :  { %371 = vsyncpa [#allocation4 + $0x1], 1 }

</bundles_post_ra>
